<compile_context>
chip_gen: v7x
topology: tpu7x:2x2x1
jax: 0.10.0
libtpu: 0.0.40
codegen_flags: <defaults>
</compile_context>

<pallas_src>
import jax
import jax.numpy as jnp
from jax.experimental import pallas as pl
from jax.experimental.pallas import tpu as pltpu


def _second_order_kernel(xt_ref, r_ref, tflat_ref, ot_ref):
    # xt_ref:    (D, TN)    transposed input tile (batch on lanes)
    # r_ref:     (D, D)     linear weight R (torch Linear weight, used as-is)
    # tflat_ref: (D, D*D)   T flattened over (i, j): tflat[b, i*D + j] = T[b, i, j]
    # ot_ref:    (D, TN)    transposed output tile
    xt = xt_ref[...]
    d, tn = xt.shape

    # Linear term on the MXU: (x @ R^T)^T = R @ x^T.
    x1t = jnp.dot(r_ref[...], xt, preferred_element_type=jnp.float32)

    # outer^T[i*D + j, n] = x[n, i] * x[n, j] = xt[i, n] * xt[j, n]
    # Two vectorized broadcasts + a leading-dim reshape (lane dim untouched -> no lane shuffle).
    a = jax.lax.broadcast_in_dim(xt, (d, d, tn), (0, 2))   # a[i, j, n] = xt[i, n]
    b = jax.lax.broadcast_in_dim(xt, (d, d, tn), (1, 2))   # b[i, j, n] = xt[j, n]
    outer_t = jnp.reshape(a * b, (d * d, tn))              # (D*D, TN)

    # Quadratic term on the MXU: x2^T[b, n] = sum_{ij} T_flat[b, ij] * outer^T[ij, n].
    x2t = jnp.dot(tflat_ref[...], outer_t, preferred_element_type=jnp.float32)

    ot_ref[...] = (x1t + x2t).astype(ot_ref.dtype)


_BATCH_TILE_CAP = 4096   # lanes per grid step; multiple of 128, comfortably inside VMEM


def _round_up(v: int, m: int) -> int:
    return (v + m - 1) // m * m


def second_order_map(x, r_matrix, t_matrix, *, batch_tile=None):
    """x: (..., D); r_matrix: (D, D); t_matrix: (D, D, D) (or already flat (D, D*D))."""
    *lead, d = x.shape
    x2d = jnp.reshape(x, (-1, d))
    n = x2d.shape[0]
    dtype = x2d.dtype

    r = jnp.asarray(r_matrix, dtype)
    t3 = jnp.reshape(jnp.asarray(t_matrix, dtype), (d, d, d))

    # Pad the feature dim to a multiple of 8 (sublane alignment).  Zero padding adds nothing
    # to either the linear or the quadratic term; padded output rows are zero and sliced off.
    dp = _round_up(d, 8)
    if dp != d:
        pad = dp - d
        x2d = jnp.pad(x2d, ((0, 0), (0, pad)))
        r = jnp.pad(r, ((0, pad), (0, pad)))
        t3 = jnp.pad(t3, ((0, pad), (0, pad), (0, pad)))

    t_flat = jnp.reshape(t3, (dp, dp * dp))   # T_flat[b, i*Dp + j] = T[b, i, j]
    xt = x2d.T                                # (Dp, N): batch on the lane axis

    # Batch tile: whole batch in one grid step when small (per-step overhead dominates this
    # memory-bound op); otherwise a 128-multiple cap with a partial (masked) last block.
    if batch_tile is not None:
        tn = min(int(batch_tile), n)
    else:
        tn = n if n <= _BATCH_TILE_CAP else _BATCH_TILE_CAP
    grid = (pl.cdiv(n, tn),)

    cost = pl.CostEstimate(
        flops=2 * n * dp * dp            # linear matmul
        + n * dp * dp                    # outer-product multiplies
        + 2 * n * dp * dp * dp,          # quadratic matmul
        transcendentals=0,
        bytes_accessed=(2 * n * dp + dp * dp + dp * dp * dp) * dtype.itemsize,
    )

    out_t = pl.pallas_call(
        _second_order_kernel,
        out_shape=jax.ShapeDtypeStruct((dp, n), dtype),
        grid_spec=pltpu.PrefetchScalarGridSpec(
            num_scalar_prefetch=0,
            grid=grid,
            in_specs=[
                pl.BlockSpec((dp, tn), lambda i: (0, i)),        # x^T tile (pipelined)
                pl.BlockSpec((dp, dp), lambda i: (0, 0)),        # R, VMEM-resident
                pl.BlockSpec((dp, dp * dp), lambda i: (0, 0)),   # T_flat, VMEM-resident
            ],
            out_specs=pl.BlockSpec((dp, tn), lambda i: (0, i)),
        ),
        compiler_params=pltpu.CompilerParams(
            dimension_semantics=("parallel",)),   # batch axis: shardable across TCs on v7x
        cost_estimate=cost,
    )(xt, r, t_flat)

    out = out_t[:d, :].T                           # drop padding, back to feature-last (N, D)
    return jnp.reshape(out, (*lead, d))


def second_order_map_reference(x, r_matrix, t_matrix):
    d = x.shape[-1]
    t3 = jnp.reshape(jnp.asarray(t_matrix, x.dtype), (d, d, d))
    x1 = x @ jnp.asarray(r_matrix, x.dtype).T
    x2 = jnp.einsum('...i,...j,bij->...b', x, x, t3)
    return x1 + x2


if __name__ == "__main__":
    key = jax.random.PRNGKey(0)
    k_x, k_r, k_t, k_x2, k_x6, k_r6, k_t6 = jax.random.split(key, 7)

    N, D = 16, 8   # batch of phase-space vectors, dim = rMatrix.shape[0]

    x = jax.random.normal(k_x, (N, D), dtype=jnp.float32)
    r_matrix = jax.random.normal(k_r, (D, D), dtype=jnp.float32) * 0.1
    t_matrix = jax.random.normal(k_t, (D, D, D), dtype=jnp.float32) * 0.01

    fn = jax.jit(second_order_map, static_argnames=("batch_tile",))

    # 1) Small batch, single grid step.
    out = jax.block_until_ready(fn(x, r_matrix, t_matrix))
    ref = second_order_map_reference(x, r_matrix, t_matrix)
    assert out.shape == (N, D) and out.dtype == jnp.float32
    assert jnp.allclose(out, ref, atol=1e-4, rtol=1e-4), "mismatch vs reference (small batch)"

    # 2) Larger batch forced through the tiled / partial-last-block path (grid > 1).
    N2 = 300
    x_big = jax.random.normal(k_x2, (N2, D), dtype=jnp.float32)
    out_big = jax.block_until_ready(fn(x_big, r_matrix, t_matrix, batch_tile=128))
    ref_big = second_order_map_reference(x_big, r_matrix, t_matrix)
    assert out_big.shape == (N2, D)
    assert jnp.allclose(out_big, ref_big, atol=1e-4, rtol=1e-4), "mismatch vs reference (tiled batch)"

    # 3) Non-multiple-of-8 feature dim (6-D phase space, the typical accelerator-optics case).
    D6 = 6
    x6 = jax.random.normal(k_x6, (N, D6), dtype=jnp.float32)
    r6 = jax.random.normal(k_r6, (D6, D6), dtype=jnp.float32) * 0.1
    t6 = jax.random.normal(k_t6, (D6, D6, D6), dtype=jnp.float32) * 0.01
    out6 = jax.block_until_ready(fn(x6, r6, t6))
    ref6 = second_order_map_reference(x6, r6, t6)
    assert out6.shape == (N, D6)
    assert jnp.allclose(out6, ref6, atol=1e-4, rtol=1e-4), "mismatch vs reference (D=6 padded path)"

    print("KERNEL_OK")
</pallas_src>

<mosaic_0001>
module attributes {stable_mosaic.version = 11 : i64} {
  func.func @_second_order_kernel(%arg0: i32, %arg1: memref<8x16xf32, #tpu.memory_space<vmem>>, %arg2: memref<8x8xf32, #tpu.memory_space<vmem>>, %arg3: memref<8x64xf32, #tpu.memory_space<vmem>>, %arg4: memref<8x16xf32, #tpu.memory_space<vmem>>) attributes {dimension_semantics = [#tpu.dimension_semantics<parallel>], iteration_bounds = array<i64: 1>, scalar_prefetch = 0 : i64, scratch_operands = 0 : i64, tpu.core_type = #tpu.core_type<tc>, window_params = [{transform_indices = @transform_0, window_bounds = array<i64: 8, 16>}, {pipeline_mode = #tpu.pipeline_mode<synchronous>, transform_indices = @transform_1, window_bounds = array<i64: 8, 8>}, {pipeline_mode = #tpu.pipeline_mode<synchronous>, transform_indices = @transform_2, window_bounds = array<i64: 8, 64>}, {transform_indices = @transform_3, window_bounds = array<i64: 8, 16>}]} {
    %c0 = arith.constant 0 : index
    %c0_0 = arith.constant 0 : index
    %0 = vector.load %arg1[%c0, %c0_0] : memref<8x16xf32, #tpu.memory_space<vmem>>, vector<8x16xf32>
    %c0_1 = arith.constant 0 : index
    %c0_2 = arith.constant 0 : index
    %1 = vector.load %arg2[%c0_1, %c0_2] : memref<8x8xf32, #tpu.memory_space<vmem>>, vector<8x8xf32>
    %cst = arith.constant dense<0.000000e+00> : vector<8x16xf32>
    %2 = tpu.matmul %1, %0, %cst {dimension_numbers = #tpu.dot_dimension_numbers<[1], [0], [0], [1], [0, 0, 1, 1], [], []>} : vector<8x8xf32>, vector<8x16xf32>, vector<8x16xf32> -> vector<8x16xf32>
    %3 = vector.shape_cast %0 : vector<8x16xf32> to vector<8x1x16xf32>
    %4 = vector.broadcast %3 : vector<8x1x16xf32> to vector<8x8x16xf32>
    %5 = vector.shape_cast %0 : vector<8x16xf32> to vector<1x8x16xf32>
    %6 = vector.broadcast %5 : vector<1x8x16xf32> to vector<8x8x16xf32>
    %7 = arith.mulf %4, %6 : vector<8x8x16xf32>
    %8 = vector.shape_cast %7 : vector<8x8x16xf32> to vector<64x16xf32>
    %c0_3 = arith.constant 0 : index
    %c0_4 = arith.constant 0 : index
    %9 = vector.load %arg3[%c0_3, %c0_4] : memref<8x64xf32, #tpu.memory_space<vmem>>, vector<8x64xf32>
    %cst_5 = arith.constant dense<0.000000e+00> : vector<8x16xf32>
    %10 = tpu.matmul %9, %8, %cst_5 {dimension_numbers = #tpu.dot_dimension_numbers<[1], [0], [0], [1], [0, 0, 1, 1], [], []>} : vector<8x64xf32>, vector<64x16xf32>, vector<8x16xf32> -> vector<8x16xf32>
    %11 = arith.addf %2, %10 : vector<8x16xf32>
    %c0_6 = arith.constant 0 : index
    %c0_7 = arith.constant 0 : index
    %12 = vector.load %arg4[%c0_6, %c0_7] : memref<8x16xf32, #tpu.memory_space<vmem>>, vector<8x16xf32>
    tpu.vector_store %arg4[%c0_6, %c0_7], %11 {strides = array<i32>} : memref<8x16xf32, #tpu.memory_space<vmem>>, vector<8x16xf32>,
    return
  }
  func.func @transform_0(%arg0: i32) -> (i32, i32) {
    %c0_i32 = arith.constant 0 : i32
    %c0_i32_0 = arith.constant 0 : i32
    return %c0_i32, %arg0 : i32, i32
  }
  func.func @transform_1(%arg0: i32) -> (i32, i32) {
    %c0_i32 = arith.constant 0 : i32
    %c0_i32_0 = arith.constant 0 : i32
    %c0_i32_1 = arith.constant 0 : i32
    return %c0_i32, %c0_i32_0 : i32, i32
  }
  func.func @transform_2(%arg0: i32) -> (i32, i32) {
    %c0_i32 = arith.constant 0 : i32
    %c0_i32_0 = arith.constant 0 : i32
    %c0_i32_1 = arith.constant 0 : i32
    return %c0_i32, %c0_i32_0 : i32, i32
  }
  func.func @transform_3(%arg0: i32) -> (i32, i32) {
    %c0_i32 = arith.constant 0 : i32
    %c0_i32_0 = arith.constant 0 : i32
    return %c0_i32, %arg0 : i32, i32
  }
}

</mosaic_0001>

<bundles_post_ra>
// kernel: second_order_map.1
= control target key start
LH: loop header
LB: loop body
LE: loop exit
PB: predicated region body
PF: predicated region fallthrough
CT: control target
= control target key end

     0   :  { %v22_v0 = vlaneseq  ;;  %v360_v2 = vmov 0.0|0.0   ;;  %v361_v4 = vmov 1966171168   ;;  %v362_v6 = vmov 0.0   ;;  %s406_s0 = inlined_call_operand.vmem [shape: f32[8,16], index: 0, kind: input, shape index: {}]   ;;  %s407_s1 = inlined_call_operand.vmem [shape: f32[8,8], index: 1, kind: input, shape index: {}]   ;;  %s408_s2 = inlined_call_operand.vmem [shape: f32[8,64], index: 2, kind: input, shape index: {}]   ;;  %s409_s3 = inlined_call_operand.hbm [shape: f32[8,16], index: 3, kind: output, shape index: {}]  }
   0x1   :  { %v16_v1 = vld [vmem:[%s407_s1] sm:$0xff]  ;;  %317 = vmatprep.subr.bf16.mxu1 %v360_v2  ;;  %v20_v5 = vunpack.c.l.s4 %v361_v4  ;;  %312 = vmatprep.subr.mxu0 %v362_v6  ;;  %vm190_vm0 = vcmask 64512  }
   0x2   :  { %v15_v3 = vld [vmem:[%s406_s0] sm:$0xff] }
   0x3   :  { %8 = vsyncpa [#allocation3], 0  ;;  %v23_v7 = vshrl.u32 %v22_v0, 7  ;;  %313 = vmatpush3.msra.mxu0 %v15_v3  ;;  %vm363_vm1 = vmmov 0   ;;  %v21_v8 = vunpack.c.0.s8 %v20_v5  ;;  %v18_v9 = vcombine.high %v15_v3, %v15_v3  ;;  %v115_v44 = vld [vmem:[%s408_s2] sm:$0xff]  ;;  %s364_s16 = smov [#allocation2]  }
   0x4   :  { %314 = vmatprep.mubr.msk.f32.mxu0 %vm363_vm1, %v362_v6  ;;  %309 = vmatprep.mubr.msk.f32.mxu1 %vm363_vm1, %v362_v6  ;;  %vm116_vm2 = vcmask 523264   ;;  %s272_s17 = sshll.u32 %s364_s16, 4  ;;  %vm264_vm3 = vcmask 130048   ;;  %s273_s17 = int_to_ptr.vmem [resolvable:$true] %s272_s17 }
   0x5   :  { %315 = vmatmul.mubr.msk.f32.vlgmr.msra.gmra.mrb[0].mxu0 %vm190_vm0, %v16_v1  ;;  %v24_v10 = vsub.s32 %v21_v8, %v23_v7  ;;  %v69_v12 = vsub.s32 0, %v23_v7  ;;  %s336_s18 = scalar_lea.vmem %s273_s17, 128  ;;  %p341_p1 = scmp.lt.s32.totalorder %s273_s17, %s273_s17 }
   0x6   :  { %p337_p0 = scmp.ne.s32.totalorder %s273_s17, %s336_s18  ;;  %p342_p2 = scmp.lt.s32.totalorder %s336_s18, %s336_s18 }
   0x7   :  { %v25_v11 = vrot.slane %v15_v3, %v24_v10  ;;  %v32_v13 = vrot.slane %v18_v9, %v24_v10 }
   0x8   :  { %p343_p3 = por %p342_p2, %p341_p1 }
   0x9   :  { %v33_v14 = vcombine.high %v25_v11, %v25_v11  ;;  %v41_v15 = vrot.slane %v25_v11, %v24_v10  ;;  %v34_v16 = vcombine.high %v32_v13, %v32_v13  ;;  %v48_v17 = vrot.slane %v32_v13, %v24_v10 }
   0xa   :  { %p344_p4 = pnand %p343_p3, %p337_p0 }
   0xb   :  { %v55_v18 = vrot.slane %v33_v14, %v24_v10  ;;  %v63_v19 = vcombine.high %v41_v15, %v41_v15  ;;  %v70_v20 = vrot.slane %v41_v15, %v69_v12  ;;  %v62_v21 = vrot.slane %v34_v16, %v24_v10 }
   0xc   :  { %v86_v26 = vrot.slane %v48_v17, %v69_v12  ;;  %v64_v28 = vcombine.high %v48_v17, %v48_v17 }
   0xd   :  { %v65_v22 = vcombine.high %v55_v18, %v55_v18  ;;  %v74_v23 = vrot.slane %v55_v18, %v69_v12  ;;  %v107_v24 = vmul.f32 %v70_v20, %v15_v3  ;;  %v78_v25 = vrot.slane %v63_v19, %v69_v12 }
   0xe   :  { %v90_v27 = vrot.slane %v62_v21, %v69_v12  ;;  %v66_v32 = vcombine.high %v62_v21, %v62_v21  ;;  %v111_v35 = vmul.f32 %v86_v26, %v15_v3  ;;  %v94_v38 = vrot.slane %v64_v28, %v69_v12 }
   0xf   :  { %v108_v29 = vmul.f32 %v74_v23, %v15_v3  ;;  %v82_v30 = vrot.slane %v65_v22, %v69_v12  ;;  %v109_v31 = vmul.f32 %v78_v25, %v15_v3 }
  0x10   :  { %v112_v37 = vmul.f32 %v90_v27, %v15_v3  ;;  %v98_v39 = vrot.slane %v66_v32, %v69_v12  ;;  %v113_v41 = vmul.f32 %v94_v38, %v15_v3 }
  0x11   :  { %v318_v33 = vpack.c.bf16 %v108_v29, %v107_v24  ;;  %v110_v34 = vmul.f32 %v82_v30, %v15_v3 }
  0x12   :  { %v324_v40 = vpack.c.bf16 %v112_v37, %v111_v35  ;;  %v114_v42 = vmul.f32 %v98_v39, %v15_v3 }
  0x13   :  { %319 = vmatpush3.bf16.msra.mxu1 %v318_v33  ;;  %v321_v36 = vpack.c.bf16 %v110_v34, %v109_v31 }
  0x14   :  { %320 = vmatprep.subr.bf16.mxu1 %v360_v2  ;;  %v327_v43 = vpack.c.bf16 %v114_v42, %v113_v41 }
  0x17   :  { %322 = vmatpush3.bf16.msra.mxu1 %v321_v36 }
  0x18   :  { %323 = vmatprep.subr.bf16.mxu1 %v360_v2 }
  0x1b   :  { %325 = vmatpush3.bf16.msra.mxu1 %v324_v40 }
  0x1c   :  { %326 = vmatprep.subr.bf16.mxu1 %v360_v2 }
  0x1f   :  { %328 = vmatpush3.bf16.msra.mxu1 %v327_v43 }
  0x22   :  { %310 = vmatmul.mubr.msk.f32.vlgmr.msra.gmra.mrb[0].mxu1 %vm116_vm2, %v115_v44 }
  0xd8   :  { %v260_v45 = vpop.f32.mrb[0].mxu0 }
  0xd9   :  { %v316_v46 = vpop.f32.mrb[1].mxu0 }
  0xf5   :  { %v186_v47 = vpop.f32.mrb[0].mxu1 }
  0xf6   :  { %v261_v48 = vadd.f32 %v260_v45, %v186_v47  ;;  %v311_v49 = vpop.f32.mrb[1].mxu1 }
  0xf8   :  { %265 = vst.msk [vmem:[#allocation2] sm:$0xff] %vm264_vm3, %v261_v48 }
  0xf9   :  { %347 = shalt.err (!%p344_p4)
}
  0xfa   :  { %s348_s20 = scalar_lea.hbm %s409_s3, 128 }
  0xfb   :  { %p349_p5 = scmp.ne.s32.totalorder %s409_s3, %s348_s20  ;;  %p352_p6 = scmp.lt.u32.totalorder %s348_s20, %s409_s3 }
  0xfd   :  { %p354_p7 = pnand %p352_p6, %p349_p5 }
  0xff   :  { %357 = shalt.err (!%p354_p7)
}
 0x100   :  { %275 = dma.vmem_to_hbm [thread:$0]  %s273_s17, 128, %s409_s3, [#allocation3]  }
 0x101   :  { %358 = dma.done.wait [#allocation3], 128  }
 0x102   :  { %359 = vsyncadd [#allocation3], 4294967168 }
 0x103   :  { %279 = vsyncpa [#allocation3], 1 }

</bundles_post_ra>
